<compile_context>
chip_gen: v6e
topology: v6e:2x2x1
jax: 0.10.0
libtpu: 0.0.40
codegen_flags: <defaults>
</compile_context>

<pallas_src>
import functools
import math

import jax
import jax.numpy as jnp
from jax import lax
from jax.experimental import pallas as pl
from jax.experimental.pallas import tpu as pltpu


# ---------------------------------------------------------------------------
# Fused CrossAttention kernel (single grid step, everything in VMEM)
# ---------------------------------------------------------------------------
def _fused_cross_attn_kernel(xd_ref, xe_ref,
                             wimg_ref, bimg_ref,
                             wcap_ref, bcap_ref,
                             wproj_ref, bproj_ref,
                             o_ref, *, B, H, N_dec, N_enc):
    C = wcap_ref.shape[1]
    hd = C // H

    # --- fused projections: two full-width MXU matmuls, activations stay in VMEM ---
    kv = (jnp.dot(xe_ref[...], wimg_ref[...], preferred_element_type=jnp.float32)
          + bimg_ref[...])                                   # (B*N_enc, 2C)
    q = (jnp.dot(xd_ref[...], wcap_ref[...], preferred_element_type=jnp.float32)
         + bcap_ref[...])                                    # (B*N_dec, C); 1/sqrt(hd)
                                                             # already folded into wcap/bcap
    k = kv[:, :C]
    v = kv[:, C:]

    bproj = bproj_ref[...]                                   # (1, C)

    # --- attention + c_proj, unrolled over (batch, head) inside the single grid step ---
    # Per-head outputs (hd = 8 lanes) are never stored; they are folded directly into the
    # lane-dense (C-wide) c_proj accumulator:  y @ Wp == sum_h y[:, h] @ Wp[h, :].
    for b in range(B):
        qb = q[b * N_dec:(b + 1) * N_dec, :]                 # (N_dec, C)
        kb = k[b * N_enc:(b + 1) * N_enc, :]                 # (N_enc, C)
        vb = v[b * N_enc:(b + 1) * N_enc, :]                 # (N_enc, C)
        acc = jnp.zeros((N_dec, C), jnp.float32)
        for h in range(H):
            qh = qb[:, h * hd:(h + 1) * hd]                  # (N_dec, hd)
            kh = kb[:, h * hd:(h + 1) * hd]                  # (N_enc, hd)
            vh = vb[:, h * hd:(h + 1) * hd]                  # (N_enc, hd)

            # scores: contract last dims of q and k directly (no k.T materialization)
            s = lax.dot_general(qh, kh, (((1,), (1,)), ((), ())),
                                preferred_element_type=jnp.float32)  # (N_dec, N_enc)

            # numerically-stable softmax over encoder positions (f32 math)
            m = jnp.max(s, axis=-1, keepdims=True)
            p = jnp.exp(s - m)
            denom = jnp.sum(p, axis=-1, keepdims=True)
            p = p * pl.reciprocal(denom, approx=True)        # EUP vrcp: ~free slot

            # PV in V's native dtype with f32 accumulation (bf16-ready)
            yh = jnp.dot(p.astype(vh.dtype), vh,
                         preferred_element_type=jnp.float32) # (N_dec, hd)

            # fold this head straight into the c_proj result
            wp = wproj_ref[h * hd:(h + 1) * hd, :]           # (hd, C)
            acc = acc + jnp.dot(yh.astype(wp.dtype), wp,
                                preferred_element_type=jnp.float32)

        # single lane-dense store per batch row-block
        o_ref[b * N_dec:(b + 1) * N_dec, :] = (acc + bproj).astype(o_ref.dtype)


# ---------------------------------------------------------------------------
# Parameter preparation (one-time, host/JAX side — NOT per-call kernel work)
# ---------------------------------------------------------------------------
def prepare_params(params, n_head):
    """Fold 1/sqrt(head_dim) into caption_attn weights and reshape biases to (1, N)."""
    w_img, b_img, w_cap, b_cap, w_proj, b_proj = params
    C = w_cap.shape[0]
    hd = C // n_head
    scale = 1.0 / math.sqrt(hd)
    return (w_img, b_img.reshape(1, -1),
            w_cap * scale, (b_cap * scale).reshape(1, -1),
            w_proj, b_proj.reshape(1, -1))


# ---------------------------------------------------------------------------
# Full CrossAttention forward (one pallas_call)
# ---------------------------------------------------------------------------
def cross_attention(x_dec, x_enc, prepared_params, n_head):
    w_img, b_img2, w_cap_s, b_cap2, w_proj, b_proj2 = prepared_params
    B, N_enc, C = x_enc.shape
    _, N_dec, _ = x_dec.shape

    xd = x_dec.reshape(B * N_dec, C)
    xe = x_enc.reshape(B * N_enc, C)

    kernel = functools.partial(_fused_cross_attn_kernel,
                               B=B, H=n_head, N_dec=N_dec, N_enc=N_enc)

    out = pl.pallas_call(
        kernel,
        out_shape=jax.ShapeDtypeStruct((B * N_dec, C), x_dec.dtype),
        grid=(1,),  # single step: whole problem fits comfortably in VMEM (~20 KB)
        in_specs=[
            pl.BlockSpec((B * N_dec, C), lambda i: (0, 0)),   # x_dec (flattened)
            pl.BlockSpec((B * N_enc, C), lambda i: (0, 0)),   # x_enc (flattened)
            pl.BlockSpec((C, 2 * C), lambda i: (0, 0)),       # w_img
            pl.BlockSpec((1, 2 * C), lambda i: (0, 0)),       # b_img
            pl.BlockSpec((C, C), lambda i: (0, 0)),           # w_cap (pre-scaled)
            pl.BlockSpec((1, C), lambda i: (0, 0)),           # b_cap (pre-scaled)
            pl.BlockSpec((C, C), lambda i: (0, 0)),           # w_proj
            pl.BlockSpec((1, C), lambda i: (0, 0)),           # b_proj
        ],
        out_specs=pl.BlockSpec((B * N_dec, C), lambda i: (0, 0)),
        compiler_params=pltpu.CompilerParams(
            dimension_semantics=("arbitrary",)),
    )(xd, xe, w_img, b_img2, w_cap_s, b_cap2, w_proj, b_proj2)

    return out.reshape(B, N_dec, C)

# TODO(synk): if this module is scaled to realistic sizes (C >= 1024, N >= 1k), replace the
# whole-array blocks with (8,128)-aligned M/N/K tiles + f32 VMEM accumulator and an explicit
# vmem_limit_bytes (v7x has only 64 MiB physical VMEM).


# ---------------------------------------------------------------------------
# Pure-JAX reference (for numeric sanity check; uses the RAW, unscaled params)
# ---------------------------------------------------------------------------
def cross_attention_ref(x_dec, x_enc, params, n_head):
    w_img, b_img, w_cap, b_cap, w_proj, b_proj = params
    B, N_enc, C = x_enc.shape
    _, N_dec, _ = x_dec.shape
    hd = C // n_head
    kv = x_enc @ w_img + b_img
    k_enc, v_enc = kv[..., :C], kv[..., C:]
    q_dec = x_dec @ w_cap + b_cap
    k = k_enc.reshape(B, N_enc, n_head, hd).transpose(0, 2, 1, 3)
    v = v_enc.reshape(B, N_enc, n_head, hd).transpose(0, 2, 1, 3)
    q = q_dec.reshape(B, N_dec, n_head, hd).transpose(0, 2, 1, 3)
    att = (q @ k.transpose(0, 1, 3, 2)) * (1.0 / math.sqrt(hd))
    att = jax.nn.softmax(att, axis=-1)
    y = (att @ v).transpose(0, 2, 1, 3).reshape(B, N_dec, C)
    return y @ w_proj + b_proj


if __name__ == "__main__":
    # Small config consistent with the module: n_embd=32, n_head=4.
    B, N_dec, N_enc, C, H = 2, 8, 16, 32, 4

    key = jax.random.PRNGKey(0)
    ks = jax.random.split(key, 8)
    scale = 1.0 / math.sqrt(C)

    # Parameters (deterministic; Linear weights stored as (in, out)).
    w_img = jax.random.normal(ks[0], (C, 2 * C), jnp.float32) * scale   # img_attn
    b_img = jax.random.normal(ks[1], (2 * C,), jnp.float32) * scale
    w_cap = jax.random.normal(ks[2], (C, C), jnp.float32) * scale       # caption_attn
    b_cap = jax.random.normal(ks[3], (C,), jnp.float32) * scale
    w_proj = jax.random.normal(ks[4], (C, C), jnp.float32) * scale      # c_proj
    b_proj = jax.random.normal(ks[5], (C,), jnp.float32) * scale
    params = (w_img, b_img, w_cap, b_cap, w_proj, b_proj)

    # One-time parameter prep (scale folding + bias reshape), outside the kernel.
    prepared = prepare_params(params, H)

    # Inputs.
    x_dec = jax.random.normal(ks[6], (B, N_dec, C), jnp.float32)
    x_enc = jax.random.normal(ks[7], (B, N_enc, C), jnp.float32)

    out = cross_attention(x_dec, x_enc, prepared, H)
    out = jax.block_until_ready(out)

    ref = cross_attention_ref(x_dec, x_enc, params, H)
    assert out.shape == (B, N_dec, C)
    # Slightly relaxed tolerance: softmax normalization uses the EUP approx reciprocal.
    assert jnp.allclose(out, ref, atol=5e-3, rtol=5e-3), "mismatch vs reference"

    print("KERNEL_OK")
</pallas_src>

<mosaic_0001>
module attributes {stable_mosaic.version = 11 : i64} {
  func.func @_fused_cross_attn_kernel(%arg0: i32, %arg1: memref<16x32xf32, #tpu.memory_space<vmem>>, %arg2: memref<32x32xf32, #tpu.memory_space<vmem>>, %arg3: memref<32x64xf32, #tpu.memory_space<vmem>>, %arg4: memref<1x64xf32, #tpu.memory_space<vmem>>, %arg5: memref<32x32xf32, #tpu.memory_space<vmem>>, %arg6: memref<1x32xf32, #tpu.memory_space<vmem>>, %arg7: memref<32x32xf32, #tpu.memory_space<vmem>>, %arg8: memref<1x32xf32, #tpu.memory_space<vmem>>, %arg9: memref<16x32xf32, #tpu.memory_space<vmem>>) attributes {dimension_semantics = [#tpu.dimension_semantics<arbitrary>], iteration_bounds = array<i64: 1>, scalar_prefetch = 0 : i64, scratch_operands = 0 : i64, tpu.core_type = #tpu.core_type<tc>, window_params = [{pipeline_mode = #tpu.pipeline_mode<synchronous>, transform_indices = @transform_0, window_bounds = array<i64: 16, 32>}, {pipeline_mode = #tpu.pipeline_mode<synchronous>, transform_indices = @transform_1, window_bounds = array<i64: 32, 32>}, {pipeline_mode = #tpu.pipeline_mode<synchronous>, transform_indices = @transform_2, window_bounds = array<i64: 32, 64>}, {pipeline_mode = #tpu.pipeline_mode<synchronous>, transform_indices = @transform_3, window_bounds = array<i64: 1, 64>}, {pipeline_mode = #tpu.pipeline_mode<synchronous>, transform_indices = @transform_4, window_bounds = array<i64: 32, 32>}, {pipeline_mode = #tpu.pipeline_mode<synchronous>, transform_indices = @transform_5, window_bounds = array<i64: 1, 32>}, {pipeline_mode = #tpu.pipeline_mode<synchronous>, transform_indices = @transform_6, window_bounds = array<i64: 32, 32>}, {pipeline_mode = #tpu.pipeline_mode<synchronous>, transform_indices = @transform_7, window_bounds = array<i64: 1, 32>}, {pipeline_mode = #tpu.pipeline_mode<synchronous>, transform_indices = @transform_8, window_bounds = array<i64: 16, 32>}]} {
    %c0 = arith.constant 0 : index
    %c0_0 = arith.constant 0 : index
    %0 = vector.load %arg2[%c0, %c0_0] : memref<32x32xf32, #tpu.memory_space<vmem>>, vector<32x32xf32>
    %c0_1 = arith.constant 0 : index
    %c0_2 = arith.constant 0 : index
    %1 = vector.load %arg3[%c0_1, %c0_2] : memref<32x64xf32, #tpu.memory_space<vmem>>, vector<32x64xf32>
    %cst = arith.constant dense<0.000000e+00> : vector<32x64xf32>
    %2 = tpu.matmul %0, %1, %cst {dimension_numbers = #tpu.dot_dimension_numbers<[1], [0], [0], [1], [0, 0, 1, 1], [], []>} : vector<32x32xf32>, vector<32x64xf32>, vector<32x64xf32> -> vector<32x64xf32>
    %c0_3 = arith.constant 0 : index
    %c0_4 = arith.constant 0 : index
    %3 = vector.load %arg4[%c0_3, %c0_4] : memref<1x64xf32, #tpu.memory_space<vmem>>, vector<1x64xf32>
    %4 = vector.broadcast %3 : vector<1x64xf32> to vector<32x64xf32>
    %5 = arith.addf %2, %4 : vector<32x64xf32>
    %c0_5 = arith.constant 0 : index
    %c0_6 = arith.constant 0 : index
    %6 = vector.load %arg1[%c0_5, %c0_6] : memref<16x32xf32, #tpu.memory_space<vmem>>, vector<16x32xf32>
    %c0_7 = arith.constant 0 : index
    %c0_8 = arith.constant 0 : index
    %7 = vector.load %arg5[%c0_7, %c0_8] : memref<32x32xf32, #tpu.memory_space<vmem>>, vector<32x32xf32>
    %cst_9 = arith.constant dense<0.000000e+00> : vector<16x32xf32>
    %8 = tpu.matmul %6, %7, %cst_9 {dimension_numbers = #tpu.dot_dimension_numbers<[1], [0], [0], [1], [0, 0, 1, 1], [], []>} : vector<16x32xf32>, vector<32x32xf32>, vector<16x32xf32> -> vector<16x32xf32>
    %c0_10 = arith.constant 0 : index
    %c0_11 = arith.constant 0 : index
    %9 = vector.load %arg6[%c0_10, %c0_11] : memref<1x32xf32, #tpu.memory_space<vmem>>, vector<1x32xf32>
    %10 = vector.broadcast %9 : vector<1x32xf32> to vector<16x32xf32>
    %11 = arith.addf %8, %10 : vector<16x32xf32>
    %12 = vector.extract_strided_slice %5 {offsets = [0, 0], sizes = [32, 32], strides = [1, 1]} : vector<32x64xf32> to vector<32x32xf32>
    %13 = vector.extract_strided_slice %5 {offsets = [0, 32], sizes = [32, 32], strides = [1, 1]} : vector<32x64xf32> to vector<32x32xf32>
    %c0_12 = arith.constant 0 : index
    %c0_13 = arith.constant 0 : index
    %14 = vector.load %arg8[%c0_12, %c0_13] : memref<1x32xf32, #tpu.memory_space<vmem>>, vector<1x32xf32>
    %15 = vector.extract_strided_slice %11 {offsets = [0, 0], sizes = [8, 32], strides = [1, 1]} : vector<16x32xf32> to vector<8x32xf32>
    %16 = vector.extract_strided_slice %12 {offsets = [0, 0], sizes = [16, 32], strides = [1, 1]} : vector<32x32xf32> to vector<16x32xf32>
    %17 = vector.extract_strided_slice %13 {offsets = [0, 0], sizes = [16, 32], strides = [1, 1]} : vector<32x32xf32> to vector<16x32xf32>
    %cst_14 = arith.constant 0.000000e+00 : f32
    %18 = vector.broadcast %cst_14 : f32 to vector<8x32xf32>
    %19 = vector.extract_strided_slice %15 {offsets = [0, 0], sizes = [8, 8], strides = [1, 1]} : vector<8x32xf32> to vector<8x8xf32>
    %20 = vector.extract_strided_slice %16 {offsets = [0, 0], sizes = [16, 8], strides = [1, 1]} : vector<16x32xf32> to vector<16x8xf32>
    %21 = vector.extract_strided_slice %17 {offsets = [0, 0], sizes = [16, 8], strides = [1, 1]} : vector<16x32xf32> to vector<16x8xf32>
    %cst_15 = arith.constant dense<0.000000e+00> : vector<8x16xf32>
    %22 = tpu.matmul %19, %20, %cst_15 {dimension_numbers = #tpu.dot_dimension_numbers<[1], [1], [0], [0], [0, 0, 1, 0], [], []>} : vector<8x8xf32>, vector<16x8xf32>, vector<8x16xf32> -> vector<8x16xf32>
    %cst_16 = arith.constant dense<0xFF800000> : vector<8xf32>
    %23 = vector.multi_reduction <maximumf>, %22, %cst_16 [1] : vector<8x16xf32> to vector<8xf32>
    %24 = vector.shape_cast %23 : vector<8xf32> to vector<8x1xf32>
    %25 = vector.broadcast %24 : vector<8x1xf32> to vector<8x16xf32>
    %26 = arith.subf %22, %25 : vector<8x16xf32>
    %27 = math.exp %26 : vector<8x16xf32>
    %cst_17 = arith.constant dense<0.000000e+00> : vector<8xf32>
    %28 = vector.multi_reduction <add>, %27, %cst_17 [1] : vector<8x16xf32> to vector<8xf32>
    %29 = vector.shape_cast %28 : vector<8xf32> to vector<8x1xf32>
    %30 = tpu.reciprocal %29 {approx = true} : vector<8x1xf32> -> vector<8x1xf32>
    %31 = vector.broadcast %30 : vector<8x1xf32> to vector<8x16xf32>
    %32 = arith.mulf %27, %31 : vector<8x16xf32>
    %cst_18 = arith.constant dense<0.000000e+00> : vector<8x8xf32>
    %33 = tpu.matmul %32, %21, %cst_18 {dimension_numbers = #tpu.dot_dimension_numbers<[1], [0], [0], [1], [0, 0, 1, 1], [], []>} : vector<8x16xf32>, vector<16x8xf32>, vector<8x8xf32> -> vector<8x8xf32>
    %c0_19 = arith.constant 0 : index
    %c0_20 = arith.constant 0 : index
    %34 = vector.load %arg7[%c0_19, %c0_20] : memref<32x32xf32, #tpu.memory_space<vmem>>, vector<8x32xf32>
    %cst_21 = arith.constant dense<0.000000e+00> : vector<8x32xf32>
    %35 = tpu.matmul %33, %34, %cst_21 {dimension_numbers = #tpu.dot_dimension_numbers<[1], [0], [0], [1], [0, 0, 1, 1], [], []>} : vector<8x8xf32>, vector<8x32xf32>, vector<8x32xf32> -> vector<8x32xf32>
    %36 = arith.addf %18, %35 : vector<8x32xf32>
    %37 = vector.extract_strided_slice %15 {offsets = [0, 8], sizes = [8, 8], strides = [1, 1]} : vector<8x32xf32> to vector<8x8xf32>
    %38 = vector.extract_strided_slice %16 {offsets = [0, 8], sizes = [16, 8], strides = [1, 1]} : vector<16x32xf32> to vector<16x8xf32>
    %39 = vector.extract_strided_slice %17 {offsets = [0, 8], sizes = [16, 8], strides = [1, 1]} : vector<16x32xf32> to vector<16x8xf32>
    %cst_22 = arith.constant dense<0.000000e+00> : vector<8x16xf32>
    %40 = tpu.matmul %37, %38, %cst_22 {dimension_numbers = #tpu.dot_dimension_numbers<[1], [1], [0], [0], [0, 0, 1, 0], [], []>} : vector<8x8xf32>, vector<16x8xf32>, vector<8x16xf32> -> vector<8x16xf32>
    %cst_23 = arith.constant dense<0xFF800000> : vector<8xf32>
    %41 = vector.multi_reduction <maximumf>, %40, %cst_23 [1] : vector<8x16xf32> to vector<8xf32>
    %42 = vector.shape_cast %41 : vector<8xf32> to vector<8x1xf32>
    %43 = vector.broadcast %42 : vector<8x1xf32> to vector<8x16xf32>
    %44 = arith.subf %40, %43 : vector<8x16xf32>
    %45 = math.exp %44 : vector<8x16xf32>
    %cst_24 = arith.constant dense<0.000000e+00> : vector<8xf32>
    %46 = vector.multi_reduction <add>, %45, %cst_24 [1] : vector<8x16xf32> to vector<8xf32>
    %47 = vector.shape_cast %46 : vector<8xf32> to vector<8x1xf32>
    %48 = tpu.reciprocal %47 {approx = true} : vector<8x1xf32> -> vector<8x1xf32>
    %49 = vector.broadcast %48 : vector<8x1xf32> to vector<8x16xf32>
    %50 = arith.mulf %45, %49 : vector<8x16xf32>
    %cst_25 = arith.constant dense<0.000000e+00> : vector<8x8xf32>
    %51 = tpu.matmul %50, %39, %cst_25 {dimension_numbers = #tpu.dot_dimension_numbers<[1], [0], [0], [1], [0, 0, 1, 1], [], []>} : vector<8x16xf32>, vector<16x8xf32>, vector<8x8xf32> -> vector<8x8xf32>
    %c8 = arith.constant 8 : index
    %c0_26 = arith.constant 0 : index
    %52 = vector.load %arg7[%c8, %c0_26] : memref<32x32xf32, #tpu.memory_space<vmem>>, vector<8x32xf32>
    %cst_27 = arith.constant dense<0.000000e+00> : vector<8x32xf32>
    %53 = tpu.matmul %51, %52, %cst_27 {dimension_numbers = #tpu.dot_dimension_numbers<[1], [0], [0], [1], [0, 0, 1, 1], [], []>} : vector<8x8xf32>, vector<8x32xf32>, vector<8x32xf32> -> vector<8x32xf32>
    %54 = arith.addf %36, %53 : vector<8x32xf32>
    %55 = vector.extract_strided_slice %15 {offsets = [0, 16], sizes = [8, 8], strides = [1, 1]} : vector<8x32xf32> to vector<8x8xf32>
    %56 = vector.extract_strided_slice %16 {offsets = [0, 16], sizes = [16, 8], strides = [1, 1]} : vector<16x32xf32> to vector<16x8xf32>
    %57 = vector.extract_strided_slice %17 {offsets = [0, 16], sizes = [16, 8], strides = [1, 1]} : vector<16x32xf32> to vector<16x8xf32>
    %cst_28 = arith.constant dense<0.000000e+00> : vector<8x16xf32>
    %58 = tpu.matmul %55, %56, %cst_28 {dimension_numbers = #tpu.dot_dimension_numbers<[1], [1], [0], [0], [0, 0, 1, 0], [], []>} : vector<8x8xf32>, vector<16x8xf32>, vector<8x16xf32> -> vector<8x16xf32>
    %cst_29 = arith.constant dense<0xFF800000> : vector<8xf32>
    %59 = vector.multi_reduction <maximumf>, %58, %cst_29 [1] : vector<8x16xf32> to vector<8xf32>
    %60 = vector.shape_cast %59 : vector<8xf32> to vector<8x1xf32>
    %61 = vector.broadcast %60 : vector<8x1xf32> to vector<8x16xf32>
    %62 = arith.subf %58, %61 : vector<8x16xf32>
    %63 = math.exp %62 : vector<8x16xf32>
    %cst_30 = arith.constant dense<0.000000e+00> : vector<8xf32>
    %64 = vector.multi_reduction <add>, %63, %cst_30 [1] : vector<8x16xf32> to vector<8xf32>
    %65 = vector.shape_cast %64 : vector<8xf32> to vector<8x1xf32>
    %66 = tpu.reciprocal %65 {approx = true} : vector<8x1xf32> -> vector<8x1xf32>
    %67 = vector.broadcast %66 : vector<8x1xf32> to vector<8x16xf32>
    %68 = arith.mulf %63, %67 : vector<8x16xf32>
    %cst_31 = arith.constant dense<0.000000e+00> : vector<8x8xf32>
    %69 = tpu.matmul %68, %57, %cst_31 {dimension_numbers = #tpu.dot_dimension_numbers<[1], [0], [0], [1], [0, 0, 1, 1], [], []>} : vector<8x16xf32>, vector<16x8xf32>, vector<8x8xf32> -> vector<8x8xf32>
    %c16 = arith.constant 16 : index
    %c0_32 = arith.constant 0 : index
    %70 = vector.load %arg7[%c16, %c0_32] : memref<32x32xf32, #tpu.memory_space<vmem>>, vector<8x32xf32>
    %cst_33 = arith.constant dense<0.000000e+00> : vector<8x32xf32>
    %71 = tpu.matmul %69, %70, %cst_33 {dimension_numbers = #tpu.dot_dimension_numbers<[1], [0], [0], [1], [0, 0, 1, 1], [], []>} : vector<8x8xf32>, vector<8x32xf32>, vector<8x32xf32> -> vector<8x32xf32>
    %72 = arith.addf %54, %71 : vector<8x32xf32>
    %73 = vector.extract_strided_slice %15 {offsets = [0, 24], sizes = [8, 8], strides = [1, 1]} : vector<8x32xf32> to vector<8x8xf32>
    %74 = vector.extract_strided_slice %16 {offsets = [0, 24], sizes = [16, 8], strides = [1, 1]} : vector<16x32xf32> to vector<16x8xf32>
    %75 = vector.extract_strided_slice %17 {offsets = [0, 24], sizes = [16, 8], strides = [1, 1]} : vector<16x32xf32> to vector<16x8xf32>
    %cst_34 = arith.constant dense<0.000000e+00> : vector<8x16xf32>
    %76 = tpu.matmul %73, %74, %cst_34 {dimension_numbers = #tpu.dot_dimension_numbers<[1], [1], [0], [0], [0, 0, 1, 0], [], []>} : vector<8x8xf32>, vector<16x8xf32>, vector<8x16xf32> -> vector<8x16xf32>
    %cst_35 = arith.constant dense<0xFF800000> : vector<8xf32>
    %77 = vector.multi_reduction <maximumf>, %76, %cst_35 [1] : vector<8x16xf32> to vector<8xf32>
    %78 = vector.shape_cast %77 : vector<8xf32> to vector<8x1xf32>
    %79 = vector.broadcast %78 : vector<8x1xf32> to vector<8x16xf32>
    %80 = arith.subf %76, %79 : vector<8x16xf32>
    %81 = math.exp %80 : vector<8x16xf32>
    %cst_36 = arith.constant dense<0.000000e+00> : vector<8xf32>
    %82 = vector.multi_reduction <add>, %81, %cst_36 [1] : vector<8x16xf32> to vector<8xf32>
    %83 = vector.shape_cast %82 : vector<8xf32> to vector<8x1xf32>
    %84 = tpu.reciprocal %83 {approx = true} : vector<8x1xf32> -> vector<8x1xf32>
    %85 = vector.broadcast %84 : vector<8x1xf32> to vector<8x16xf32>
    %86 = arith.mulf %81, %85 : vector<8x16xf32>
    %cst_37 = arith.constant dense<0.000000e+00> : vector<8x8xf32>
    %87 = tpu.matmul %86, %75, %cst_37 {dimension_numbers = #tpu.dot_dimension_numbers<[1], [0], [0], [1], [0, 0, 1, 1], [], []>} : vector<8x16xf32>, vector<16x8xf32>, vector<8x8xf32> -> vector<8x8xf32>
    %c24 = arith.constant 24 : index
    %c0_38 = arith.constant 0 : index
    %88 = vector.load %arg7[%c24, %c0_38] : memref<32x32xf32, #tpu.memory_space<vmem>>, vector<8x32xf32>
    %cst_39 = arith.constant dense<0.000000e+00> : vector<8x32xf32>
    %89 = tpu.matmul %87, %88, %cst_39 {dimension_numbers = #tpu.dot_dimension_numbers<[1], [0], [0], [1], [0, 0, 1, 1], [], []>} : vector<8x8xf32>, vector<8x32xf32>, vector<8x32xf32> -> vector<8x32xf32>
    %90 = arith.addf %72, %89 : vector<8x32xf32>
    %91 = vector.broadcast %14 : vector<1x32xf32> to vector<8x32xf32>
    %92 = arith.addf %90, %91 : vector<8x32xf32>
    %c0_40 = arith.constant 0 : index
    %c0_41 = arith.constant 0 : index
    %93 = vector.load %arg9[%c0_40, %c0_41] : memref<16x32xf32, #tpu.memory_space<vmem>>, vector<8x32xf32>
    tpu.vector_store %arg9[%c0_40, %c0_41], %92 {strides = array<i32>} : memref<16x32xf32, #tpu.memory_space<vmem>>, vector<8x32xf32>,
    %94 = vector.extract_strided_slice %11 {offsets = [8, 0], sizes = [8, 32], strides = [1, 1]} : vector<16x32xf32> to vector<8x32xf32>
    %95 = vector.extract_strided_slice %12 {offsets = [16, 0], sizes = [16, 32], strides = [1, 1]} : vector<32x32xf32> to vector<16x32xf32>
    %96 = vector.extract_strided_slice %13 {offsets = [16, 0], sizes = [16, 32], strides = [1, 1]} : vector<32x32xf32> to vector<16x32xf32>
    %cst_42 = arith.constant 0.000000e+00 : f32
    %97 = vector.broadcast %cst_42 : f32 to vector<8x32xf32>
    %98 = vector.extract_strided_slice %94 {offsets = [0, 0], sizes = [8, 8], strides = [1, 1]} : vector<8x32xf32> to vector<8x8xf32>
    %99 = vector.extract_strided_slice %95 {offsets = [0, 0], sizes = [16, 8], strides = [1, 1]} : vector<16x32xf32> to vector<16x8xf32>
    %100 = vector.extract_strided_slice %96 {offsets = [0, 0], sizes = [16, 8], strides = [1, 1]} : vector<16x32xf32> to vector<16x8xf32>
    %cst_43 = arith.constant dense<0.000000e+00> : vector<8x16xf32>
    %101 = tpu.matmul %98, %99, %cst_43 {dimension_numbers = #tpu.dot_dimension_numbers<[1], [1], [0], [0], [0, 0, 1, 0], [], []>} : vector<8x8xf32>, vector<16x8xf32>, vector<8x16xf32> -> vector<8x16xf32>
    %cst_44 = arith.constant dense<0xFF800000> : vector<8xf32>
    %102 = vector.multi_reduction <maximumf>, %101, %cst_44 [1] : vector<8x16xf32> to vector<8xf32>
    %103 = vector.shape_cast %102 : vector<8xf32> to vector<8x1xf32>
    %104 = vector.broadcast %103 : vector<8x1xf32> to vector<8x16xf32>
    %105 = arith.subf %101, %104 : vector<8x16xf32>
    %106 = math.exp %105 : vector<8x16xf32>
    %cst_45 = arith.constant dense<0.000000e+00> : vector<8xf32>
    %107 = vector.multi_reduction <add>, %106, %cst_45 [1] : vector<8x16xf32> to vector<8xf32>
    %108 = vector.shape_cast %107 : vector<8xf32> to vector<8x1xf32>
    %109 = tpu.reciprocal %108 {approx = true} : vector<8x1xf32> -> vector<8x1xf32>
    %110 = vector.broadcast %109 : vector<8x1xf32> to vector<8x16xf32>
    %111 = arith.mulf %106, %110 : vector<8x16xf32>
    %cst_46 = arith.constant dense<0.000000e+00> : vector<8x8xf32>
    %112 = tpu.matmul %111, %100, %cst_46 {dimension_numbers = #tpu.dot_dimension_numbers<[1], [0], [0], [1], [0, 0, 1, 1], [], []>} : vector<8x16xf32>, vector<16x8xf32>, vector<8x8xf32> -> vector<8x8xf32>
    %c0_47 = arith.constant 0 : index
    %c0_48 = arith.constant 0 : index
    %113 = vector.load %arg7[%c0_47, %c0_48] : memref<32x32xf32, #tpu.memory_space<vmem>>, vector<8x32xf32>
    %cst_49 = arith.constant dense<0.000000e+00> : vector<8x32xf32>
    %114 = tpu.matmul %112, %113, %cst_49 {dimension_numbers = #tpu.dot_dimension_numbers<[1], [0], [0], [1], [0, 0, 1, 1], [], []>} : vector<8x8xf32>, vector<8x32xf32>, vector<8x32xf32> -> vector<8x32xf32>
    %115 = arith.addf %97, %114 : vector<8x32xf32>
    %116 = vector.extract_strided_slice %94 {offsets = [0, 8], sizes = [8, 8], strides = [1, 1]} : vector<8x32xf32> to vector<8x8xf32>
    %117 = vector.extract_strided_slice %95 {offsets = [0, 8], sizes = [16, 8], strides = [1, 1]} : vector<16x32xf32> to vector<16x8xf32>
    %118 = vector.extract_strided_slice %96 {offsets = [0, 8], sizes = [16, 8], strides = [1, 1]} : vector<16x32xf32> to vector<16x8xf32>
    %cst_50 = arith.constant dense<0.000000e+00> : vector<8x16xf32>
    %119 = tpu.matmul %116, %117, %cst_50 {dimension_numbers = #tpu.dot_dimension_numbers<[1], [1], [0], [0], [0, 0, 1, 0], [], []>} : vector<8x8xf32>, vector<16x8xf32>, vector<8x16xf32> -> vector<8x16xf32>
    %cst_51 = arith.constant dense<0xFF800000> : vector<8xf32>
    %120 = vector.multi_reduction <maximumf>, %119, %cst_51 [1] : vector<8x16xf32> to vector<8xf32>
    %121 = vector.shape_cast %120 : vector<8xf32> to vector<8x1xf32>
    %122 = vector.broadcast %121 : vector<8x1xf32> to vector<8x16xf32>
    %123 = arith.subf %119, %122 : vector<8x16xf32>
    %124 = math.exp %123 : vector<8x16xf32>
    %cst_52 = arith.constant dense<0.000000e+00> : vector<8xf32>
    %125 = vector.multi_reduction <add>, %124, %cst_52 [1] : vector<8x16xf32> to vector<8xf32>
    %126 = vector.shape_cast %125 : vector<8xf32> to vector<8x1xf32>
    %127 = tpu.reciprocal %126 {approx = true} : vector<8x1xf32> -> vector<8x1xf32>
    %128 = vector.broadcast %127 : vector<8x1xf32> to vector<8x16xf32>
    %129 = arith.mulf %124, %128 : vector<8x16xf32>
    %cst_53 = arith.constant dense<0.000000e+00> : vector<8x8xf32>
    %130 = tpu.matmul %129, %118, %cst_53 {dimension_numbers = #tpu.dot_dimension_numbers<[1], [0], [0], [1], [0, 0, 1, 1], [], []>} : vector<8x16xf32>, vector<16x8xf32>, vector<8x8xf32> -> vector<8x8xf32>
    %c8_54 = arith.constant 8 : index
    %c0_55 = arith.constant 0 : index
    %131 = vector.load %arg7[%c8_54, %c0_55] : memref<32x32xf32, #tpu.memory_space<vmem>>, vector<8x32xf32>
    %cst_56 = arith.constant dense<0.000000e+00> : vector<8x32xf32>
    %132 = tpu.matmul %130, %131, %cst_56 {dimension_numbers = #tpu.dot_dimension_numbers<[1], [0], [0], [1], [0, 0, 1, 1], [], []>} : vector<8x8xf32>, vector<8x32xf32>, vector<8x32xf32> -> vector<8x32xf32>
    %133 = arith.addf %115, %132 : vector<8x32xf32>
    %134 = vector.extract_strided_slice %94 {offsets = [0, 16], sizes = [8, 8], strides = [1, 1]} : vector<8x32xf32> to vector<8x8xf32>
    %135 = vector.extract_strided_slice %95 {offsets = [0, 16], sizes = [16, 8], strides = [1, 1]} : vector<16x32xf32> to vector<16x8xf32>
    %136 = vector.extract_strided_slice %96 {offsets = [0, 16], sizes = [16, 8], strides = [1, 1]} : vector<16x32xf32> to vector<16x8xf32>
    %cst_57 = arith.constant dense<0.000000e+00> : vector<8x16xf32>
    %137 = tpu.matmul %134, %135, %cst_57 {dimension_numbers = #tpu.dot_dimension_numbers<[1], [1], [0], [0], [0, 0, 1, 0], [], []>} : vector<8x8xf32>, vector<16x8xf32>, vector<8x16xf32> -> vector<8x16xf32>
    %cst_58 = arith.constant dense<0xFF800000> : vector<8xf32>
    %138 = vector.multi_reduction <maximumf>, %137, %cst_58 [1] : vector<8x16xf32> to vector<8xf32>
    %139 = vector.shape_cast %138 : vector<8xf32> to vector<8x1xf32>
    %140 = vector.broadcast %139 : vector<8x1xf32> to vector<8x16xf32>
    %141 = arith.subf %137, %140 : vector<8x16xf32>
    %142 = math.exp %141 : vector<8x16xf32>
    %cst_59 = arith.constant dense<0.000000e+00> : vector<8xf32>
    %143 = vector.multi_reduction <add>, %142, %cst_59 [1] : vector<8x16xf32> to vector<8xf32>
    %144 = vector.shape_cast %143 : vector<8xf32> to vector<8x1xf32>
    %145 = tpu.reciprocal %144 {approx = true} : vector<8x1xf32> -> vector<8x1xf32>
    %146 = vector.broadcast %145 : vector<8x1xf32> to vector<8x16xf32>
    %147 = arith.mulf %142, %146 : vector<8x16xf32>
    %cst_60 = arith.constant dense<0.000000e+00> : vector<8x8xf32>
    %148 = tpu.matmul %147, %136, %cst_60 {dimension_numbers = #tpu.dot_dimension_numbers<[1], [0], [0], [1], [0, 0, 1, 1], [], []>} : vector<8x16xf32>, vector<16x8xf32>, vector<8x8xf32> -> vector<8x8xf32>
    %c16_61 = arith.constant 16 : index
    %c0_62 = arith.constant 0 : index
    %149 = vector.load %arg7[%c16_61, %c0_62] : memref<32x32xf32, #tpu.memory_space<vmem>>, vector<8x32xf32>
    %cst_63 = arith.constant dense<0.000000e+00> : vector<8x32xf32>
    %150 = tpu.matmul %148, %149, %cst_63 {dimension_numbers = #tpu.dot_dimension_numbers<[1], [0], [0], [1], [0, 0, 1, 1], [], []>} : vector<8x8xf32>, vector<8x32xf32>, vector<8x32xf32> -> vector<8x32xf32>
    %151 = arith.addf %133, %150 : vector<8x32xf32>
    %152 = vector.extract_strided_slice %94 {offsets = [0, 24], sizes = [8, 8], strides = [1, 1]} : vector<8x32xf32> to vector<8x8xf32>
    %153 = vector.extract_strided_slice %95 {offsets = [0, 24], sizes = [16, 8], strides = [1, 1]} : vector<16x32xf32> to vector<16x8xf32>
    %154 = vector.extract_strided_slice %96 {offsets = [0, 24], sizes = [16, 8], strides = [1, 1]} : vector<16x32xf32> to vector<16x8xf32>
    %cst_64 = arith.constant dense<0.000000e+00> : vector<8x16xf32>
    %155 = tpu.matmul %152, %153, %cst_64 {dimension_numbers = #tpu.dot_dimension_numbers<[1], [1], [0], [0], [0, 0, 1, 0], [], []>} : vector<8x8xf32>, vector<16x8xf32>, vector<8x16xf32> -> vector<8x16xf32>
    %cst_65 = arith.constant dense<0xFF800000> : vector<8xf32>
    %156 = vector.multi_reduction <maximumf>, %155, %cst_65 [1] : vector<8x16xf32> to vector<8xf32>
    %157 = vector.shape_cast %156 : vector<8xf32> to vector<8x1xf32>
    %158 = vector.broadcast %157 : vector<8x1xf32> to vector<8x16xf32>
    %159 = arith.subf %155, %158 : vector<8x16xf32>
    %160 = math.exp %159 : vector<8x16xf32>
    %cst_66 = arith.constant dense<0.000000e+00> : vector<8xf32>
    %161 = vector.multi_reduction <add>, %160, %cst_66 [1] : vector<8x16xf32> to vector<8xf32>
    %162 = vector.shape_cast %161 : vector<8xf32> to vector<8x1xf32>
    %163 = tpu.reciprocal %162 {approx = true} : vector<8x1xf32> -> vector<8x1xf32>
    %164 = vector.broadcast %163 : vector<8x1xf32> to vector<8x16xf32>
    %165 = arith.mulf %160, %164 : vector<8x16xf32>
    %cst_67 = arith.constant dense<0.000000e+00> : vector<8x8xf32>
    %166 = tpu.matmul %165, %154, %cst_67 {dimension_numbers = #tpu.dot_dimension_numbers<[1], [0], [0], [1], [0, 0, 1, 1], [], []>} : vector<8x16xf32>, vector<16x8xf32>, vector<8x8xf32> -> vector<8x8xf32>
    %c24_68 = arith.constant 24 : index
    %c0_69 = arith.constant 0 : index
    %167 = vector.load %arg7[%c24_68, %c0_69] : memref<32x32xf32, #tpu.memory_space<vmem>>, vector<8x32xf32>
    %cst_70 = arith.constant dense<0.000000e+00> : vector<8x32xf32>
    %168 = tpu.matmul %166, %167, %cst_70 {dimension_numbers = #tpu.dot_dimension_numbers<[1], [0], [0], [1], [0, 0, 1, 1], [], []>} : vector<8x8xf32>, vector<8x32xf32>, vector<8x32xf32> -> vector<8x32xf32>
    %169 = arith.addf %151, %168 : vector<8x32xf32>
    %170 = vector.broadcast %14 : vector<1x32xf32> to vector<8x32xf32>
    %171 = arith.addf %169, %170 : vector<8x32xf32>
    %c8_71 = arith.constant 8 : index
    %c0_72 = arith.constant 0 : index
    %172 = vector.load %arg9[%c8_71, %c0_72] : memref<16x32xf32, #tpu.memory_space<vmem>>, vector<8x32xf32>
    tpu.vector_store %arg9[%c8_71, %c0_72], %171 {strides = array<i32>} : memref<16x32xf32, #tpu.memory_space<vmem>>, vector<8x32xf32>,
    return
  }
  func.func @transform_0(%arg0: i32) -> (i32, i32) {
    %c0_i32 = arith.constant 0 : i32
    %c0_i32_0 = arith.constant 0 : i32
    %c0_i32_1 = arith.constant 0 : i32
    return %c0_i32, %c0_i32_0 : i32, i32
  }
  func.func @transform_1(%arg0: i32) -> (i32, i32) {
    %c0_i32 = arith.constant 0 : i32
    %c0_i32_0 = arith.constant 0 : i32
    %c0_i32_1 = arith.constant 0 : i32
    return %c0_i32, %c0_i32_0 : i32, i32
  }
  func.func @transform_2(%arg0: i32) -> (i32, i32) {
    %c0_i32 = arith.constant 0 : i32
    %c0_i32_0 = arith.constant 0 : i32
    %c0_i32_1 = arith.constant 0 : i32
    return %c0_i32, %c0_i32_0 : i32, i32
  }
  func.func @transform_3(%arg0: i32) -> (i32, i32) {
    %c0_i32 = arith.constant 0 : i32
    %c0_i32_0 = arith.constant 0 : i32
    %c0_i32_1 = arith.constant 0 : i32
    return %c0_i32, %c0_i32_0 : i32, i32
  }
  func.func @transform_4(%arg0: i32) -> (i32, i32) {
    %c0_i32 = arith.constant 0 : i32
    %c0_i32_0 = arith.constant 0 : i32
    %c0_i32_1 = arith.constant 0 : i32
    return %c0_i32, %c0_i32_0 : i32, i32
  }
  func.func @transform_5(%arg0: i32) -> (i32, i32) {
    %c0_i32 = arith.constant 0 : i32
    %c0_i32_0 = arith.constant 0 : i32
    %c0_i32_1 = arith.constant 0 : i32
    return %c0_i32, %c0_i32_0 : i32, i32
  }
  func.func @transform_6(%arg0: i32) -> (i32, i32) {
    %c0_i32 = arith.constant 0 : i32
    %c0_i32_0 = arith.constant 0 : i32
    %c0_i32_1 = arith.constant 0 : i32
    return %c0_i32, %c0_i32_0 : i32, i32
  }
  func.func @transform_7(%arg0: i32) -> (i32, i32) {
    %c0_i32 = arith.constant 0 : i32
    %c0_i32_0 = arith.constant 0 : i32
    %c0_i32_1 = arith.constant 0 : i32
    return %c0_i32, %c0_i32_0 : i32, i32
  }
  func.func @transform_8(%arg0: i32) -> (i32, i32) {
    %c0_i32 = arith.constant 0 : i32
    %c0_i32_0 = arith.constant 0 : i32
    %c0_i32_1 = arith.constant 0 : i32
    return %c0_i32, %c0_i32_0 : i32, i32
  }
}

</mosaic_0001>

<bundles_post_ra>
// kernel: tpu_custom_call.1
= control target key start
LH: loop header
LB: loop body
LE: loop exit
PB: predicated region body
PF: predicated region fallthrough
CT: control target
= control target key end

     0   :  { %13 = vsyncpa [#allocation3], 0  ;;  %s3164_s0 = inlined_call_operand.hbm [shape: f32[16,32], index: 0, kind: input, shape index: {}]   ;;  %s3165_s1 = inlined_call_operand.hbm [shape: f32[32,32], index: 1, kind: input, shape index: {}]   ;;  %s3166_s2 = inlined_call_operand.hbm [shape: f32[32,64], index: 2, kind: input, shape index: {}]   ;;  %s3167_s3 = inlined_call_operand.vmem [shape: f32[1,64], index: 3, kind: input, shape index: {}]   ;;  %s3168_s4 = inlined_call_operand.hbm [shape: f32[32,32], index: 4, kind: input, shape index: {}]   ;;  %s3169_s5 = inlined_call_operand.vmem [shape: f32[1,32], index: 5, kind: input, shape index: {}]   ;;  %s3170_s6 = inlined_call_operand.hbm [shape: f32[32,32], index: 6, kind: input, shape index: {}]   ;;  %s3171_s7 = inlined_call_operand.vmem [shape: f32[1,32], index: 7, kind: input, shape index: {}]   ;;  %s3172_s8 = inlined_call_operand.hbm [shape: f32[16,32], index: 8, kind: output, shape index: {}]  }
   0x1   :  { %14 = vsyncpa [#allocation6], 0 }
   0x2   :  { %15 = vsyncpa [#allocation9], 0 }
   0x3   :  { %16 = vsyncpa [#allocation4], 0  ;;  %s2784_s27 = smov [#allocation5]   ;;  %s2785_s29 = smov [#allocation8]  }
   0x4   :  { %s34_s28 = sshll.u32 %s2784_s27, 4  ;;  %s60_s30 = sshll.u32 %s2785_s29, 4  ;;  %s35_s28 = int_to_ptr.vmem [resolvable:$true] %s34_s28  ;;  %s61_s30 = int_to_ptr.vmem [resolvable:$true] %s60_s30 }
   0x5   :  { %s2664_s9 = scalar_lea.vmem %s35_s28, 512  ;;  %p2669_p1 = scmp.lt.s32.totalorder %s35_s28, %s35_s28 }
   0x6   :  { %p2665_p0 = scmp.ne.s32.totalorder %s35_s28, %s2664_s9  ;;  %p2670_p2 = scmp.lt.s32.totalorder %s2664_s9, %s2664_s9 }
   0x8   :  { %p2671_p3 = por %p2670_p2, %p2669_p1 }
   0xa   :  { %p2672_p4 = pnand %p2671_p3, %p2665_p0 }
   0xc   :  { %2675 = shalt.err (!%p2672_p4)
}
   0xd   :  { %s2786_s10 = smov 128   ;;  %s2787_s11 = smov 8  }
   0xe   :  { %40 = dma.hbm_to_vmem [thread:$0]  %s3165_s1, 512, %s35_s28, [#allocation6], %s2786_s10, %s2786_s10, %s2787_s11  }
   0xf   :  { %s2684_s14 = scalar_lea.vmem %s61_s30, 512  ;;  %p2689_p6 = scmp.lt.s32.totalorder %s61_s30, %s61_s30 }
  0x10   :  { %p2685_p5 = scmp.ne.s32.totalorder %s61_s30, %s2684_s14  ;;  %p2690_p7 = scmp.lt.s32.totalorder %s2684_s14, %s2684_s14 }
  0x12   :  { %p2691_p8 = por %p2690_p7, %p2689_p6 }
  0x14   :  { %p2692_p9 = pnand %p2691_p8, %p2685_p5 }
  0x16   :  { %2695 = shalt.err (!%p2692_p9)
}
  0x17   :  { %66 = dma.hbm_to_vmem [thread:$0]  %s3168_s4, 512, %s61_s30, [#allocation9], %s2786_s10, %s2786_s10, %s2787_s11  }
  0x18   :  { %s2788_s17 = smov [#allocation2]   ;;  %s2789_s19 = smov [#allocation7]  }
  0x19   :  { %s22_s18 = sshll.u32 %s2788_s17, 4  ;;  %s46_s20 = sshll.u32 %s2789_s19, 4  ;;  %s23_s18 = int_to_ptr.vmem [resolvable:$true] %s22_s18  ;;  %s47_s20 = int_to_ptr.vmem [resolvable:$true] %s46_s20 }
  0x1a   :  { %s2704_s1 = scalar_lea.vmem %s23_s18, 256  ;;  %p2709_p11 = scmp.lt.s32.totalorder %s23_s18, %s23_s18 }
  0x1b   :  { %p2705_p10 = scmp.ne.s32.totalorder %s23_s18, %s2704_s1  ;;  %p2710_p12 = scmp.lt.s32.totalorder %s2704_s1, %s2704_s1 }
  0x1d   :  { %p2711_p13 = por %p2710_p12, %p2709_p11 }
  0x1f   :  { %p2712_p0 = pnand %p2711_p13, %p2705_p10 }
  0x21   :  { %2715 = shalt.err (!%p2712_p0)
}
  0x22   :  { %28 = dma.hbm_to_vmem [thread:$0]  %s3164_s0, 256, %s23_s18, [#allocation3], %s2786_s10, %s2786_s10, %s2787_s11  }
  0x23   :  { %s2724_s4 = scalar_lea.vmem %s47_s20, 512  ;;  %p2729_p2 = scmp.lt.s32.totalorder %s47_s20, %s47_s20 }
  0x24   :  { %p2725_p1 = scmp.ne.s32.totalorder %s47_s20, %s2724_s4  ;;  %p2730_p3 = scmp.lt.s32.totalorder %s2724_s4, %s2724_s4 }
  0x26   :  { %p2731_p4 = por %p2730_p3, %p2729_p2 }
  0x28   :  { %p2732_p5 = pnand %p2731_p4, %p2725_p1 }
  0x2a   :  { %2735 = shalt.err (!%p2732_p5)
}
  0x2b   :  { %52 = dma.hbm_to_vmem [thread:$0]  %s3166_s2, 512, %s47_s20, [#allocation6], %s2786_s10, %s2786_s10, %s2787_s11  }
  0x2c   :  { %s2790_s25 = smov [#allocation10]  }
  0x2d   :  { %s74_s26 = sshll.u32 %s2790_s25, 4  ;;  %s75_s26 = int_to_ptr.vmem [resolvable:$true] %s74_s26 }
  0x2e   :  { %s2744_s27 = scalar_lea.vmem %s75_s26, 512  ;;  %p2749_p7 = scmp.lt.s32.totalorder %s75_s26, %s75_s26 }
  0x2f   :  { %p2745_p6 = scmp.ne.s32.totalorder %s75_s26, %s2744_s27  ;;  %p2750_p8 = scmp.lt.s32.totalorder %s2744_s27, %s2744_s27 }
  0x31   :  { %p2751_p9 = por %p2750_p8, %p2749_p7 }
  0x33   :  { %p2752_p10 = pnand %p2751_p9, %p2745_p6 }
  0x35   :  { %2755 = shalt.err (!%p2752_p10)
}
  0x36   :  { %80 = dma.hbm_to_vmem [thread:$0]  %s3170_s6, 512, %s75_s26, [#allocation9], %s2786_s10, %s2786_s10, %s2787_s11  }
  0x37   :  { %2776 = dma.done.wait [#allocation3], 256  }
  0x38   :  { %2777 = vsyncadd [#allocation3], 4294967040 }
  0x39   :  { %2778 = dma.done.wait [#allocation6], 1024  }
  0x3a   :  { %2779 = vsyncadd [#allocation6], 4294966272 }
  0x3b   :  { %2780 = dma.done.wait [#allocation9], 1024  }
  0x3c   :  { %2781 = vsyncadd [#allocation9], 4294966272  ;;  %v105_v0 = vld [vmem:[#allocation7 + $0x18] sm:$0xff]  ;;  %v104_v1 = vld [vmem:[#allocation7 + $0x10] sm:$0xff]  ;;  %vm113_vm0 = vcmask 261120   ;;  %v2791_v12 = vmov 0.0  }
  0x3d   :  { %2430 = vmatprep.subr.mxu0 %v105_v0  ;;  %v216_v2 = vld [vmem:[#allocation8 + $0x18] sm:$0xff]  ;;  %v215_v3 = vld [vmem:[#allocation8 + $0x10] sm:$0xff]  ;;  %v103_v4 = vld [vmem:[#allocation7 + $0x8] sm:$0xff]  ;;  %vm2792_vm1 = vmmov 0   ;;  %vm306_vm2 = vcmask 64512   ;;  %s2793_s9 = smov 96  }
  0x3e   :  { %2431 = vmatpush3.msra.mxu0 %v105_v0  ;;  %2444 = vmatprep.subr.mxu1 %v216_v2  ;;  %v98_v5 = vld [vmem:[#allocation5] sm:$0xff]  ;;  %v214_v7 = vld [vmem:[#allocation8 + $0x8] sm:$0xff]  ;;  %v211_v10 = vld [vmem:[#allocation2] sm:$0xff]  ;;  %vm386_vm3 = vcmask 130048   ;;  %s2796_s12 = smov 112   ;;  %s2797_s13 = smov 104  }
  0x3f   :  { %2432 = vmatprep.subr.mxu0 %v104_v1  ;;  %2445 = vmatpush3.msra.mxu1 %v216_v2  ;;  %v102_v6 = vld [vmem:[#allocation7] sm:$0xff]  ;;  %v99_v8 = vld [vmem:[#allocation5 + $0x8] sm:$0xff]  ;;  %v212_v11 = vld [vmem:[#allocation2 + $0x8] sm:$0xff]  ;;  %s2798_s14 = smov 80   ;;  %s2799_s15 = smov 72  }
  0x40   :  { %2433 = vmatpush3.msra.mxu0 %v104_v1  ;;  %2446 = vmatprep.subr.mxu1 %v215_v3  ;;  %v213_v9 = vld [vmem:[#allocation8] sm:$0xff]  ;;  %v100_v13 = vld [vmem:[#allocation5 + $0x10] sm:$0xff]  ;;  %v101_v14 = vld [vmem:[#allocation5 + $0x18] sm:$0xff] }
  0x41   :  { %2434 = vmatprep.subr.mxu0 %v103_v4  ;;  %2438 = vmatprep.mubr.msk.f32.mxu0 %vm113_vm0, %v98_v5  ;;  %v2891_v15 = vld [vmem:[%s3167_s3] ss:$0 sm:$0xff]  ;;  %s2794_s3 = smov 120   ;;  %v2940_v43 = vld [vmem:[#allocation10] sm:$0xff]  ;;  %v2967_v61 = vld [vmem:[#allocation10 + $0x8] sm:$0xff] }
  0x42   :  { %2435 = vmatpush3.msra.mxu0 %v103_v4  ;;  %2447 = vmatpush3.msra.mxu1 %v215_v3  ;;  %v2308_v17 = vld [vmem:[%s3169_s5] ss:$0 sm:$0xff]  ;;  %s2795_s5 = smov 88  }
  0x43   :  { %2436 = vmatprep.subr.mxu0 %v102_v6  ;;  %2448 = vmatprep.subr.mxu1 %v214_v7 }
  0x44   :  { %2437 = vmatpush3.msra.mxu0 %v102_v6  ;;  %2449 = vmatpush3.msra.mxu1 %v214_v7 }
  0x45   :  { %2439 = vmatmul.mubr.msk.f32.vlgmr.msra.gmra.mxu0 %vm113_vm0, %v99_v8  ;;  %2450 = vmatprep.subr.mxu1 %v213_v9 }
  0x46   :  { %2451 = vmatpush3.msra.mxu1 %v213_v9  ;;  %2452 = vmatprep.mubr.msk.f32.mxu1 %vm113_vm0, %v211_v10 }
  0x47   :  { %2453 = vmatmul.mubr.msk.f32.vlgmr.msra.gmra.mxu1 %vm113_vm0, %v212_v11  ;;  %2455 = vmatprep.subr.mxu0 %v2791_v12 }
  0x48   :  { %2462 = vmatprep.subr.mxu1 %v2791_v12  ;;  %2441 = vmatprep.mubr.msk.f32.mxu0 %vm113_vm0, %v100_v13 }
  0x49   :  { %2442 = vmatmul.mubr.msk.f32.gmra.mxu0 %vm113_vm0, %v101_v14  ;;  %2466 = vmatprep.mubr.msk.f32.mxu1 %vm2792_vm1, %v2791_v12 }
  0x4a   :  { %2459 = vmatprep.mubr.msk.f32.mxu0 %vm2792_vm1, %v2791_v12 }
 0x105   :  { %v2440_v16 = vpop.f32.mrf.mxu0 }
 0x106   :  { %v2897_v18 = vadd.f32 %v2440_v16, %v2891_v15 }
 0x107   :  { %v192_v19 = vpop.f32.mrf.mxu0  ;;  %v2454_v20 = vpop.f32.mrf.mxu1 }
 0x108   :  { %400 = vrot.lane.b32.xlu1 %v2897_v18, %s2793_s9  ;;  %2456 = vmatpush3.xpose.msk.msra.mxu0 %vm306_vm2, %v2897_v18  ;;  %v2903_v21 = vadd.f32 %v2454_v20, %v2308_v17  ;;  %v2907_v22 = vadd.f32 %v2891_v15, %v192_v19 }
 0x109   :  { %2457 = vmatprep.subr.mxu0 %v2791_v12  ;;  %v296_v23 = vpop.f32.mrf.mxu1  ;;  %v2922_v27 = vpop.f32.mrf.mxu0 }
 0x10a   :  { %v297_v24 = vadd.f32 %v2308_v17, %v296_v23  ;;  %v2990_v5 = vadd.f32 %v2922_v27, %v2891_v15 }
 0x10b   :  { %v2924_v28 = vpop.f32.mrf.mxu0 }
 0x10c   :  { %398 = vrot.lane.b32.xlu1 %v2907_v22, %s2793_s9  ;;  %2458 = vmatpush3.xpose.msk.msra.mxu0 %vm306_vm2, %v2907_v22  ;;  %v3000_v7 = vadd.f32 %v2891_v15, %v2924_v28 }
 0x10d   :  { %2476 = vmatprep.subr.mxu0 %v2791_v12 }
 0x10f   :  { %2460 = vmatmul.mubr.msk.f32.vlgmr.msra.gmra.mxu0 %vm306_vm2, %v297_v24 }
 0x110   :  { %480 = vrot.lane.b32.xlu1 %v2907_v22, %s2794_s3  ;;  %2480 = vmatprep.mubr.msk.f32.mxu0 %vm2792_vm1, %v2791_v12 }
 0x114   :  { %478 = vrot.lane.b32.xlu1 %v297_v24, %s2794_s3 }
 0x17a   :  { %v401_v25 = vpop.permute.xlu1 %400 }
 0x17b   :  { %2463 = vmatpush3.msra.mxu1 %v401_v25 }
 0x17c   :  { %2464 = vmatprep.subr.mxu1 %v2791_v12 }
 0x17e   :  { %v399_v26 = vpop.permute.xlu1 %398 }
 0x17f   :  { %2465 = vmatpush3.msra.mxu1 %v399_v26 }
 0x180   :  { %2469 = vmatprep.subr.mxu1 %v2791_v12 }
 0x182   :  { %v481_v41 = vpop.permute.xlu1 %480 }
 0x186   :  { %v479_v42 = vpop.permute.xlu1 %478 }
 0x1cf   :  { %v382_v29 = vpop.f32.mrf.mxu0 }
 0x1d0   :  { %v387_v30 = vsel %vm386_vm3, %v382_v29, -inf }
 0x1d1   :  { %388 = vmax.xlane.f32.xlu0 %v387_v30  ;;  %v2461_v31 = vpop.f32.mrf.mxu0 }
 0x25a   :  { %v389_v32 = vpop.xlane.xlu0 %388 }
 0x25b   :  { %v390_v33 = vsub.f32 %v382_v29, %v389_v32 }
 0x25d   :  { %v391_v34 = vmul.f32 1.442695, %v390_v33 }
 0x25f   :  { %2624 = vpow2.f32 %v391_v34 }
 0x26c   :  { %v2625_v35 = vpop.eup %2624 }
 0x26d   :  { %v393_v36 = vsel %vm386_vm3, %v2625_v35, 0.0 }
 0x26e   :  { %394 = vadd.xlane.f32.xlu0 %v393_v36 }
 0x284   :  { %482 = vrot.lane.b32.xlu0 %v2897_v18, %s2794_s3 }
 0x2f7   :  { %v395_v37 = vpop.xlane.xlu0 %394 }
 0x2f8   :  { %2626 = vrcp.f32 %v395_v37 }
 0x2fb   :  { %v483_v40 = vpop.permute.xlu0 %482 }
 0x305   :  { %v2627_v38 = vpop.eup %2626 }
 0x306   :  { %v397_v39 = vmul.f32 %v2627_v38, %v2625_v35 }
 0x308   :  { %2467 = vmatmul.mubr.msk.f32.vlgmr.msra.gmra.mxu1 %vm386_vm3, %v397_v39 }
 0x309   :  { %2470 = vmatpush3.xpose.msk.msra.mxu1 %vm306_vm2, %v483_v40  ;;  %2473 = vmatprep.mubr.msk.f32.mxu1 %vm2792_vm1, %v2791_v12 }
 0x30a   :  { %2471 = vmatprep.subr.mxu1 %v2791_v12 }
 0x30d   :  { %2472 = vmatpush3.xpose.msk.msra.mxu1 %vm306_vm2, %v481_v41 }
 0x30e   :  { %2488 = vmatprep.subr.mxu1 %v2791_v12 }
 0x310   :  { %2474 = vmatmul.mubr.msk.f32.vlgmr.msra.gmra.mxu1 %vm306_vm2, %v479_v42  ;;  %v3037_v42 = vld [vmem:[#allocation10 + $0x10] sm:$0xff] }
 0x311   :  { %2490 = vmatprep.mubr.msk.f32.mxu1 %vm2792_vm1, %v2791_v12  ;;  %2489 = vmatpush3.msra.mxu1 %v2940_v43 }
 0x312   :  { %2500 = vmatprep.subr.mxu1 %v2791_v12 }
 0x3c8   :  { %v473_v44 = vpop.f32.mrf.mxu1 }
 0x3c9   :  { %2491 = vmatmul.mubr.msk.f32.vlgmr.msra.gmra.mxu1 %vm306_vm2, %v473_v44 }
 0x3ca   :  { %v2468_v45 = vpop.f32.mrf.mxu1  ;;  %2504 = vmatprep.mubr.msk.f32.mxu1 %vm2792_vm1, %v2791_v12 }
 0x3d0   :  { %v556_v46 = vpop.f32.mrf.mxu1 }
 0x3d1   :  { %v560_v47 = vsel %vm386_vm3, %v556_v46, -inf }
 0x3d2   :  { %561 = vmax.xlane.f32.xlu1 %v560_v47  ;;  %v2475_v48 = vpop.f32.mrf.mxu1 }
 0x3e3   :  { %573 = vrot.lane.b32.xlu1 %v2897_v18, %s2795_s5 }
 0x3e7   :  { %801 = vrot.lane.b32.xlu1 %v2897_v18, %s2796_s12 }
 0x3eb   :  { %799 = vrot.lane.b32.xlu1 %v2907_v22, %s2796_s12 }
 0x3ef   :  { %797 = vrot.lane.b32.xlu1 %v297_v24, %s2796_s12 }
 0x3f3   :  { %1048 = vrot.lane.b32.xlu1 %v2897_v18, %s2797_s13 }
 0x3f7   :  { %1044 = vrot.lane.b32.xlu1 %v297_v24, %s2797_s13 }
 0x45b   :  { %v562_v49 = vpop.xlane.xlu1 %561 }
 0x45c   :  { %v563_v50 = vsub.f32 %v556_v46, %v562_v49 }
 0x45e   :  { %v564_v51 = vmul.f32 1.442695, %v563_v50  ;;  %v3052_v50 = vld [vmem:[#allocation10 + $0x18] sm:$0xff] }
 0x45f   :  { %v574_v52 = vpop.permute.xlu1 %573 }
 0x460   :  { %2628 = vpow2.f32 %v564_v51  ;;  %2477 = vmatpush3.msra.mxu0 %v574_v52 }
 0x461   :  { %2478 = vmatprep.subr.mxu0 %v2791_v12 }
 0x463   :  { %v802_v62 = vpop.permute.xlu1 %801 }
 0x467   :  { %v800_v63 = vpop.permute.xlu1 %799 }
 0x46b   :  { %v798_v2 = vpop.permute.xlu1 %797 }
 0x46d   :  { %v2629_v53 = vpop.eup %2628 }
 0x46e   :  { %v566_v54 = vsel %vm386_vm3, %v2629_v53, 0.0 }
 0x46f   :  { %567 = vadd.xlane.f32.xlu0 %v566_v54  ;;  %v1049_v3 = vpop.permute.xlu1 %1048 }
 0x473   :  { %v1045_v6 = vpop.permute.xlu1 %1044 }
 0x485   :  { %571 = vrot.lane.b32.xlu0 %v2907_v22, %s2795_s5 }
 0x489   :  { %1046 = vrot.lane.b32.xlu0 %v2907_v22, %s2797_s13  ;;  %v2964_v55 = vpop.f32.mrf.mxu1 }
 0x48b   :  { %v2492_v56 = vpop.f32.mrf.mxu1 }
 0x4f8   :  { %v568_v57 = vpop.xlane.xlu0 %567 }
 0x4f9   :  { %2630 = vrcp.f32 %v568_v57 }
 0x4fc   :  { %v572_v58 = vpop.permute.xlu0 %571 }
 0x4fd   :  { %2479 = vmatpush3.msra.mxu0 %v572_v58 }
 0x4fe   :  { %2483 = vmatprep.subr.mxu0 %v2791_v12 }
 0x500   :  { %v1047_v4 = vpop.permute.xlu0 %1046 }
 0x506   :  { %v2631_v59 = vpop.eup %2630 }
 0x507   :  { %v570_v60 = vmul.f32 %v2631_v59, %v2629_v53 }
 0x509   :  { %2481 = vmatmul.mubr.msk.f32.vlgmr.msra.gmra.mxu0 %vm386_vm3, %v570_v60 }
 0x50a   :  { %2484 = vmatpush3.msra.mxu0 %v2967_v61  ;;  %2485 = vmatprep.mubr.msk.f32.mxu0 %vm2792_vm1, %v2791_v12 }
 0x50b   :  { %2493 = vmatprep.subr.mxu0 %v2791_v12 }
 0x5c9   :  { %v646_v0 = vpop.f32.mrf.mxu0 }
 0x5ca   :  { %2486 = vmatmul.mubr.msk.f32.vlgmr.msra.gmra.mxu0 %vm306_vm2, %v646_v0 }
 0x5cb   :  { %2494 = vmatpush3.xpose.msk.msra.mxu0 %vm306_vm2, %v802_v62  ;;  %v2482_v1 = vpop.f32.mrf.mxu0  ;;  %2497 = vmatprep.mubr.msk.f32.mxu0 %vm2792_vm1, %v2791_v12 }
 0x5cc   :  { %2495 = vmatprep.subr.mxu0 %v2791_v12 }
 0x5cf   :  { %2496 = vmatpush3.xpose.msk.msra.mxu0 %vm306_vm2, %v800_v63 }
 0x5d0   :  { %2512 = vmatprep.subr.mxu0 %v2791_v12 }
 0x5d2   :  { %2498 = vmatmul.mubr.msk.f32.vlgmr.msra.gmra.mxu0 %vm306_vm2, %v798_v2  ;;  %v3078_v2 = vld [vmem:[%s3171_s7] ss:$0 sm:$0xff]  ;;  %s2800_s7 = smov [#allocation11]  }
 0x5d3   :  { %2513 = vmatpush3.xpose.msk.msra.mxu0 %vm306_vm2, %v1049_v3  ;;  %2516 = vmatprep.mubr.msk.f32.mxu0 %vm2792_vm1, %v2791_v12  ;;  %s2289_s18 = sshll.u32 %s2800_s7, 4  ;;  %s2290_s18 = int_to_ptr.vmem [resolvable:$true] %s2289_s18 }
 0x5d4   :  { %2514 = vmatprep.subr.mxu0 %v2791_v12  ;;  %s2756_s19 = scalar_lea.vmem %s2290_s18, 256  ;;  %p2761_p12 = scmp.lt.s32.totalorder %s2290_s18, %s2290_s18 }
 0x5d5   :  { %p2757_p11 = scmp.ne.s32.totalorder %s2290_s18, %s2756_s19  ;;  %p2762_p13 = scmp.lt.s32.totalorder %s2756_s19, %s2756_s19 }
 0x5d7   :  { %2515 = vmatpush3.xpose.msk.msra.mxu0 %vm306_vm2, %v1047_v4  ;;  %p2763_p0 = por %p2762_p13, %p2761_p12 }
 0x5d8   :  { %2531 = vmatprep.subr.mxu0 %v2791_v12 }
 0x5d9   :  { %p2764_p1 = pnand %p2763_p0, %p2757_p11 }
 0x5da   :  { %2517 = vmatmul.mubr.msk.f32.vlgmr.msra.gmra.mxu0 %vm306_vm2, %v1045_v6 }
 0x5db   :  { %2532 = vmatpush3.xpose.msk.msra.mxu0 %vm306_vm2, %v2990_v5  ;;  %2535 = vmatprep.mubr.msk.f32.mxu0 %vm2792_vm1, %v2791_v12 }
 0x5dc   :  { %2533 = vmatprep.subr.mxu0 %v2791_v12 }
 0x5df   :  { %2534 = vmatpush3.xpose.msk.msra.mxu0 %vm306_vm2, %v3000_v7 }
 0x5e0   :  { %2552 = vmatprep.subr.mxu0 %v2791_v12 }
 0x5e2   :  { %2536 = vmatmul.mubr.msk.f32.vlgmr.msra.gmra.mxu0 %vm306_vm2, %v2903_v21 }
 0x5e3   :  { %2556 = vmatprep.mubr.msk.f32.mxu0 %vm2792_vm1, %v2791_v12 }
 0x68a   :  { %v3009_v8 = vpop.f32.mrf.mxu0 }
 0x68b   :  { %v794_v53 = vadd.f32 %v2964_v55, %v3009_v8 }
 0x68c   :  { %v2487_v9 = vpop.f32.mrf.mxu0 }
 0x692   :  { %v875_v10 = vpop.f32.mrf.mxu0 }
 0x693   :  { %v879_v11 = vsel %vm386_vm3, %v875_v10, -inf }
 0x694   :  { %880 = vmax.xlane.f32.xlu0 %v879_v11  ;;  %v2499_v13 = vpop.f32.mrf.mxu0 }
 0x69a   :  { %v1122_v14 = vpop.f32.mrf.mxu0 }
 0x69b   :  { %v1126_v19 = vsel %vm386_vm3, %v1122_v14, -inf }
 0x69c   :  { %v2518_v15 = vpop.f32.mrf.mxu0 }
 0x6a2   :  { %v1374_v16 = vpop.f32.mrf.mxu0 }
 0x6a3   :  { %v1378_v20 = vsel %vm386_vm3, %v1374_v16, -inf }
 0x6a4   :  { %v2537_v17 = vpop.f32.mrf.mxu0 }
 0x6aa   :  { %892 = vrot.lane.b32.xlu0 %v2897_v18, %s2798_s14 }
 0x6c9   :  { %1127 = vmax.xlane.f32.xlu0 %v1126_v19 }
 0x6df   :  { %1139 = vrot.lane.b32.xlu0 %v2897_v18, %s2799_s15 }
 0x6fe   :  { %1379 = vmax.xlane.f32.xlu0 %v1378_v20 }
 0x714   :  { %1391 = vrot.lane.b32.xlu0 %v2990_v5, %s2793_s9 }
 0x718   :  { %1473 = vrot.lane.b32.xlu0 %v2990_v5, %s2794_s3 }
 0x71c   :  { %1469 = vrot.lane.b32.xlu0 %v2903_v21, %s2794_s3 }
 0x71d   :  { %v881_v23 = vpop.xlane.xlu0 %880 }
 0x71e   :  { %v882_v24 = vsub.f32 %v875_v10, %v881_v23 }
 0x720   :  { %v883_v25 = vmul.f32 1.442695, %v882_v24 }
 0x721   :  { %v893_v26 = vpop.permute.xlu0 %892 }
 0x722   :  { %2632 = vpow2.f32 %v883_v25  ;;  %2501 = vmatpush3.msra.mxu1 %v893_v26 }
 0x723   :  { %2502 = vmatprep.subr.mxu1 %v2791_v12 }
 0x72f   :  { %v2633_v18 = vpop.eup %2632 }
 0x730   :  { %v885_v27 = vsel %vm386_vm3, %v2633_v18, 0.0 }
 0x731   :  { %886 = vadd.xlane.f32.xlu1 %v885_v27 }
 0x742   :  { %890 = vrot.lane.b32.xlu1 %v2907_v22, %s2798_s14 }
 0x752   :  { %v1128_v28 = vpop.xlane.xlu0 %1127 }
 0x753   :  { %v1129_v29 = vsub.f32 %v1122_v14, %v1128_v28 }
 0x755   :  { %v1130_v30 = vmul.f32 1.442695, %v1129_v29 }
 0x756   :  { %v1140_v33 = vpop.permute.xlu0 %1139 }
 0x757   :  { %2634 = vpow2.f32 %v1130_v30 }
 0x764   :  { %v2635_v31 = vpop.eup %2634 }
 0x765   :  { %v1132_v32 = vsel %vm386_vm3, %v2635_v31, 0.0 }
 0x766   :  { %1133 = vadd.xlane.f32.xlu1 %v1132_v32 }
 0x777   :  { %1137 = vrot.lane.b32.xlu1 %v2907_v22, %s2799_s15 }
 0x77b   :  { %1389 = vrot.lane.b32.xlu1 %v3000_v7, %s2793_s9 }
 0x787   :  { %v1380_v34 = vpop.xlane.xlu0 %1379 }
 0x788   :  { %v1381_v35 = vsub.f32 %v1374_v16, %v1380_v34 }
 0x78a   :  { %v1382_v36 = vmul.f32 1.442695, %v1381_v35 }
 0x78b   :  { %v1392_v58 = vpop.permute.xlu0 %1391 }
 0x78c   :  { %2636 = vpow2.f32 %v1382_v36 }
 0x78f   :  { %v1474_v0 = vpop.permute.xlu0 %1473 }
 0x793   :  { %v1470_v1 = vpop.permute.xlu0 %1469 }
 0x799   :  { %v2637_v37 = vpop.eup %2636 }
 0x79a   :  { %v1384_v38 = vsel %vm386_vm3, %v2637_v37, 0.0 }
 0x79f   :  { %1385 = vadd.xlane.f32.xlu1 %v1384_v38 }
 0x7b0   :  { %1471 = vrot.lane.b32.xlu1 %v3000_v7, %s2794_s3 }
 0x7ba   :  { %v887_v39 = vpop.xlane.xlu1 %886 }
 0x7bb   :  { %2638 = vrcp.f32 %v887_v39 }
 0x7be   :  { %v891_v40 = vpop.permute.xlu1 %890 }
 0x7bf   :  { %2503 = vmatpush3.msra.mxu1 %v891_v40 }
 0x7c0   :  { %2507 = vmatprep.subr.mxu1 %v2791_v12 }
 0x7c8   :  { %v2639_v22 = vpop.eup %2638 }
 0x7c9   :  { %v889_v41 = vmul.f32 %v2639_v22, %v2633_v18 }
 0x7cb   :  { %2505 = vmatmul.mubr.msk.f32.vlgmr.msra.gmra.mxu1 %vm386_vm3, %v889_v41 }
 0x7cc   :  { %2508 = vmatpush3.msra.mxu1 %v3037_v42  ;;  %2509 = vmatprep.mubr.msk.f32.mxu1 %vm2792_vm1, %v2791_v12 }
 0x7cd   :  { %2519 = vmatprep.subr.mxu1 %v2791_v12 }
 0x7ef   :  { %v1134_v44 = vpop.xlane.xlu1 %1133 }
 0x7f0   :  { %2640 = vrcp.f32 %v1134_v44 }
 0x7f3   :  { %v1138_v48 = vpop.permute.xlu1 %1137 }
 0x7f7   :  { %v1390_v51 = vpop.permute.xlu1 %1389 }
 0x7fd   :  { %v2641_v45 = vpop.eup %2640 }
 0x7fe   :  { %v1136_v49 = vmul.f32 %v2641_v45, %v2635_v31 }
 0x828   :  { %v1386_v52 = vpop.xlane.xlu1 %1385 }
 0x829   :  { %2642 = vrcp.f32 %v1386_v52 }
 0x82c   :  { %v1472_v55 = vpop.permute.xlu1 %1471 }
 0x836   :  { %v2643_v59 = vpop.eup %2642 }
 0x837   :  { %v1388_v63 = vmul.f32 %v2643_v59, %v2637_v37 }
 0x88b   :  { %v965_v46 = vpop.f32.mrf.mxu1 }
 0x88c   :  { %2510 = vmatmul.mubr.msk.f32.vlgmr.msra.gmra.mxu1 %vm306_vm2, %v965_v46 }
 0x88d   :  { %2520 = vmatpush3.msra.mxu1 %v1140_v33  ;;  %v2506_v47 = vpop.f32.mrf.mxu1  ;;  %2523 = vmatprep.mubr.msk.f32.mxu1 %vm2792_vm1, %v2791_v12 }
 0x88e   :  { %2521 = vmatprep.subr.mxu1 %v2791_v12 }
 0x88f   :  { %2522 = vmatpush3.msra.mxu1 %v1138_v48 }
 0x890   :  { %2524 = vmatmul.mubr.msk.f32.vlgmr.msra.gmra.mxu1 %vm386_vm3, %v1136_v49  ;;  %2526 = vmatprep.subr.mxu1 %v2791_v12 }
 0x891   :  { %2528 = vmatprep.mubr.msk.f32.mxu1 %vm2792_vm1, %v2791_v12  ;;  %2527 = vmatpush3.msra.mxu1 %v3052_v50 }
 0x892   :  { %2538 = vmatprep.subr.mxu1 %v2791_v12 }
 0x94c   :  { %v1039_v54 = vpop.f32.mrf.mxu1 }
 0x94d   :  { %v1043_v56 = vadd.f32 %v1039_v54, %v794_v53 }
 0x94e   :  { %v2511_v57 = vpop.f32.mrf.mxu1 }
 0x950   :  { %v1212_v60 = vpop.f32.mrf.mxu1 }
 0x951   :  { %2529 = vmatmul.mubr.msk.f32.vlgmr.msra.gmra.mxu1 %vm306_vm2, %v1212_v60 }
 0x952   :  { %2539 = vmatpush3.msra.mxu1 %v1392_v58  ;;  %v2525_v62 = vpop.f32.mrf.mxu1  ;;  %2542 = vmatprep.mubr.msk.f32.mxu1 %vm2792_vm1, %v2791_v12 }
 0x953   :  { %2540 = vmatprep.subr.mxu1 %v2791_v12 }
 0x954   :  { %2541 = vmatpush3.msra.mxu1 %v1390_v51 }
 0x955   :  { %2545 = vmatprep.subr.mxu1 %v2791_v12  ;;  %2543 = vmatmul.mubr.msk.f32.vlgmr.msra.gmra.mxu1 %vm386_vm3, %v1388_v63 }
 0x956   :  { %2546 = vmatpush3.xpose.msk.msra.mxu1 %vm306_vm2, %v1474_v0  ;;  %2549 = vmatprep.mubr.msk.f32.mxu1 %vm2792_vm1, %v2791_v12 }
 0x957   :  { %2547 = vmatprep.subr.mxu1 %v2791_v12 }
 0x95a   :  { %2548 = vmatpush3.xpose.msk.msra.mxu1 %vm306_vm2, %v1472_v55 }
 0x95b   :  { %2564 = vmatprep.subr.mxu1 %v2791_v12 }
 0x95d   :  { %2550 = vmatmul.mubr.msk.f32.vlgmr.msra.gmra.mxu1 %vm306_vm2, %v1470_v1 }
 0x95e   :  { %2565 = vmatpush3.msra.mxu1 %v2940_v43  ;;  %2566 = vmatprep.mubr.msk.f32.mxu1 %vm2792_vm1, %v2791_v12 }
 0x95f   :  { %2576 = vmatprep.subr.mxu1 %v2791_v12 }
 0xa11   :  { %v1286_v3 = vpop.f32.mrf.mxu1 }
 0xa12   :  { %v1290_v4 = vadd.f32 %v1286_v3, %v1043_v56 }
 0xa13   :  { %v2530_v6 = vpop.f32.mrf.mxu1 }
 0xa14   :  { %v1297_v8 = vadd.f32 %v3078_v2, %v1290_v4 }
 0xa15   :  { %v1464_v9 = vpop.f32.mrf.mxu1 }
 0xa16   :  { %1298 = vst.msk [vmem:[#allocation11] sm:$0xff] %vm113_vm0, %v1297_v8  ;;  %2567 = vmatmul.mubr.msk.f32.vlgmr.msra.gmra.mxu1 %vm306_vm2, %v1464_v9 }
 0xa17   :  { %v2544_v43 = vpop.f32.mrf.mxu1  ;;  %2580 = vmatprep.mubr.msk.f32.mxu1 %vm2792_vm1, %v2791_v12 }
 0xa1d   :  { %v1547_v10 = vpop.f32.mrf.mxu1 }
 0xa1e   :  { %v1551_v11 = vsel %vm386_vm3, %v1547_v10, -inf }
 0xa1f   :  { %1552 = vmax.xlane.f32.xlu1 %v1551_v11  ;;  %v2551_v13 = vpop.f32.mrf.mxu1 }
 0xa30   :  { %1562 = vrot.lane.b32.xlu1 %v3000_v7, %s2795_s5 }
 0xa34   :  { %1792 = vrot.lane.b32.xlu1 %v2990_v5, %s2796_s12 }
 0xa38   :  { %1788 = vrot.lane.b32.xlu1 %v2903_v21, %s2796_s12 }
 0xa3c   :  { %2037 = vrot.lane.b32.xlu1 %v3000_v7, %s2797_s13 }
 0xaa8   :  { %v1553_v14 = vpop.xlane.xlu1 %1552 }
 0xaa9   :  { %v1554_v15 = vsub.f32 %v1547_v10, %v1553_v14 }
 0xaab   :  { %v1555_v16 = vmul.f32 1.442695, %v1554_v15 }
 0xaac   :  { %v1563_v26 = vpop.permute.xlu1 %1562 }
 0xaad   :  { %2644 = vpow2.f32 %v1555_v16 }
 0xab0   :  { %v1793_v28 = vpop.permute.xlu1 %1792 }
 0xaba   :  { %v2645_v17 = vpop.eup %2644 }
 0xabb   :  { %v1557_v19 = vsel %vm386_vm3, %v2645_v17, 0.0 }
 0xabc   :  { %1558 = vadd.xlane.f32.xlu0 %v1557_v19 }
 0xad2   :  { %1564 = vrot.lane.b32.xlu0 %v2990_v5, %s2795_s5 }
 0xad6   :  { %1790 = vrot.lane.b32.xlu0 %v3000_v7, %s2796_s12  ;;  %v3099_v20 = vpop.f32.mrf.mxu1 }
 0xad8   :  { %v2568_v23 = vpop.f32.mrf.mxu1 }
 0xada   :  { %2039 = vrot.lane.b32.xlu0 %v2990_v5, %s2797_s13 }
 0xade   :  { %2035 = vrot.lane.b32.xlu0 %v2903_v21, %s2797_s13 }
 0xb45   :  { %v1559_v24 = vpop.xlane.xlu0 %1558 }
 0xb46   :  { %2646 = vrcp.f32 %v1559_v24 }
 0xb49   :  { %v1565_v25 = vpop.permute.xlu0 %1564 }
 0xb4a   :  { %2553 = vmatpush3.msra.mxu0 %v1565_v25 }
 0xb4b   :  { %2554 = vmatprep.subr.mxu0 %v2791_v12 }
 0xb4c   :  { %2555 = vmatpush3.msra.mxu0 %v1563_v26 }
 0xb4d   :  { %2559 = vmatprep.subr.mxu0 %v2791_v12  ;;  %v1791_v30 = vpop.permute.xlu0 %1790 }
 0xb51   :  { %v2040_v31 = vpop.permute.xlu0 %2039 }
 0xb53   :  { %v2647_v18 = vpop.eup %2646 }
 0xb54   :  { %v1561_v27 = vmul.f32 %v2647_v18, %v2645_v17 }
 0xb55   :  { %v2036_v33 = vpop.permute.xlu0 %2035 }
 0xb56   :  { %2557 = vmatmul.mubr.msk.f32.vlgmr.msra.gmra.mxu0 %vm386_vm3, %v1561_v27 }
 0xb57   :  { %2560 = vmatpush3.msra.mxu0 %v2967_v61  ;;  %2561 = vmatprep.mubr.msk.f32.mxu0 %vm2792_vm1, %v2791_v12  ;;  %v1789_v61 = vpop.permute.xlu1 %1788 }
 0xb58   :  { %2569 = vmatprep.subr.mxu0 %v2791_v12 }
 0xb5b   :  { %v2038_v32 = vpop.permute.xlu1 %2037 }
 0xc16   :  { %v1637_v21 = vpop.f32.mrf.mxu0 }
 0xc17   :  { %2562 = vmatmul.mubr.msk.f32.vlgmr.msra.gmra.mxu0 %vm306_vm2, %v1637_v21 }
 0xc18   :  { %2570 = vmatpush3.xpose.msk.msra.mxu0 %vm306_vm2, %v1793_v28  ;;  %v2558_v29 = vpop.f32.mrf.mxu0  ;;  %2573 = vmatprep.mubr.msk.f32.mxu0 %vm2792_vm1, %v2791_v12 }
 0xc19   :  { %2571 = vmatprep.subr.mxu0 %v2791_v12 }
 0xc1c   :  { %2572 = vmatpush3.xpose.msk.msra.mxu0 %vm306_vm2, %v1791_v30 }
 0xc1d   :  { %2588 = vmatprep.subr.mxu0 %v2791_v12 }
 0xc1f   :  { %2574 = vmatmul.mubr.msk.f32.vlgmr.msra.gmra.mxu0 %vm306_vm2, %v1789_v61 }
 0xc20   :  { %2589 = vmatpush3.xpose.msk.msra.mxu0 %vm306_vm2, %v2040_v31  ;;  %2592 = vmatprep.mubr.msk.f32.mxu0 %vm2792_vm1, %v2791_v12 }
 0xc21   :  { %2590 = vmatprep.subr.mxu0 %v2791_v12 }
 0xc24   :  { %2591 = vmatpush3.xpose.msk.msra.mxu0 %vm306_vm2, %v2038_v32 }
 0xc27   :  { %2593 = vmatmul.mubr.msk.f32.vlgmr.msra.gmra.mxu0 %vm306_vm2, %v2036_v33 }
 0xcd7   :  { %v1711_v34 = vpop.f32.mrf.mxu0 }
 0xcd8   :  { %v1785_v55 = vadd.f32 %v3099_v20, %v1711_v34 }
 0xcd9   :  { %v2563_v35 = vpop.f32.mrf.mxu0 }
 0xcdf   :  { %v1866_v36 = vpop.f32.mrf.mxu0 }
 0xce0   :  { %v1870_v37 = vsel %vm386_vm3, %v1866_v36, -inf }
 0xce1   :  { %1871 = vmax.xlane.f32.xlu1 %v1870_v37  ;;  %v2575_v38 = vpop.f32.mrf.mxu0 }
 0xce7   :  { %v2113_v39 = vpop.f32.mrf.mxu0 }
 0xce8   :  { %v2117_v22 = vsel %vm386_vm3, %v2113_v39, -inf }
 0xce9   :  { %v2594_v40 = vpop.f32.mrf.mxu0 }
 0xcf2   :  { %1881 = vrot.lane.b32.xlu1 %v3000_v7, %s2798_s14 }
 0xd16   :  { %2118 = vmax.xlane.f32.xlu1 %v2117_v22 }
 0xd27   :  { %2128 = vrot.lane.b32.xlu1 %v3000_v7, %s2799_s15 }
 0xd6a   :  { %v1872_v41 = vpop.xlane.xlu1 %1871 }
 0xd6b   :  { %v1873_v44 = vsub.f32 %v1866_v36, %v1872_v41 }
 0xd6d   :  { %v1874_v45 = vmul.f32 1.442695, %v1873_v44 }
 0xd6e   :  { %v1882_v48 = vpop.permute.xlu1 %1881 }
 0xd6f   :  { %2648 = vpow2.f32 %v1874_v45 }
 0xd7c   :  { %v2649_v46 = vpop.eup %2648 }
 0xd7d   :  { %v1876_v47 = vsel %vm386_vm3, %v2649_v46, 0.0 }
 0xd7e   :  { %1877 = vadd.xlane.f32.xlu0 %v1876_v47 }
 0xd94   :  { %1883 = vrot.lane.b32.xlu0 %v2990_v5, %s2798_s14 }
 0xd9f   :  { %v2119_v49 = vpop.xlane.xlu1 %2118 }
 0xda0   :  { %v2120_v51 = vsub.f32 %v2113_v39, %v2119_v49 }
 0xda2   :  { %v2121_v52 = vmul.f32 1.442695, %v2120_v51 }
 0xda3   :  { %v2129_v0 = vpop.permute.xlu1 %2128 }
 0xda4   :  { %2650 = vpow2.f32 %v2121_v52 }
 0xdb1   :  { %v2651_v53 = vpop.eup %2650 }
 0xdb2   :  { %v2123_v54 = vsel %vm386_vm3, %v2651_v53, 0.0 }
 0xdb3   :  { %2124 = vadd.xlane.f32.xlu0 %v2123_v54 }
 0xdc9   :  { %2130 = vrot.lane.b32.xlu0 %v2990_v5, %s2799_s15 }
 0xe07   :  { %v1878_v7 = vpop.xlane.xlu0 %1877 }
 0xe08   :  { %2652 = vrcp.f32 %v1878_v7 }
 0xe0b   :  { %v1884_v56 = vpop.permute.xlu0 %1883 }
 0xe0c   :  { %2577 = vmatpush3.msra.mxu1 %v1884_v56 }
 0xe0d   :  { %2578 = vmatprep.subr.mxu1 %v2791_v12 }
 0xe0e   :  { %2579 = vmatpush3.msra.mxu1 %v1882_v48 }
 0xe0f   :  { %2583 = vmatprep.subr.mxu1 %v2791_v12 }
 0xe15   :  { %v2653_v57 = vpop.eup %2652 }
 0xe16   :  { %v1880_v58 = vmul.f32 %v2653_v57, %v2649_v46 }
 0xe18   :  { %2581 = vmatmul.mubr.msk.f32.vlgmr.msra.gmra.mxu1 %vm386_vm3, %v1880_v58 }
 0xe19   :  { %2584 = vmatpush3.msra.mxu1 %v3037_v42  ;;  %2585 = vmatprep.mubr.msk.f32.mxu1 %vm2792_vm1, %v2791_v12 }
 0xe1a   :  { %2595 = vmatprep.subr.mxu1 %v2791_v12 }
 0xe3c   :  { %v2125_v5 = vpop.xlane.xlu0 %2124 }
 0xe3d   :  { %2654 = vrcp.f32 %v2125_v5 }
 0xe40   :  { %v2131_v62 = vpop.permute.xlu0 %2130 }
 0xe4a   :  { %v2655_v59 = vpop.eup %2654 }
 0xe4b   :  { %v2127_v42 = vmul.f32 %v2655_v59, %v2651_v53 }
 0xed8   :  { %v1956_v60 = vpop.f32.mrf.mxu1 }
 0xed9   :  { %2586 = vmatmul.mubr.msk.f32.vlgmr.msra.gmra.mxu1 %vm306_vm2, %v1956_v60 }
 0xeda   :  { %2596 = vmatpush3.msra.mxu1 %v2131_v62  ;;  %v2582_v63 = vpop.f32.mrf.mxu1  ;;  %2599 = vmatprep.mubr.msk.f32.mxu1 %vm2792_vm1, %v2791_v12 }
 0xedb   :  { %2597 = vmatprep.subr.mxu1 %v2791_v12 }
 0xedc   :  { %2598 = vmatpush3.msra.mxu1 %v2129_v0 }
 0xedd   :  { %2600 = vmatmul.mubr.msk.f32.vlgmr.msra.gmra.mxu1 %vm386_vm3, %v2127_v42  ;;  %2602 = vmatprep.subr.mxu1 %v2791_v12 }
 0xede   :  { %2603 = vmatpush3.msra.mxu1 %v3052_v50  ;;  %2604 = vmatprep.mubr.msk.f32.mxu1 %vm2792_vm1, %v2791_v12 }
 0xf99   :  { %v2030_v1 = vpop.f32.mrf.mxu1 }
 0xf9a   :  { %v2034_v3 = vadd.f32 %v2030_v1, %v1785_v55 }
 0xf9b   :  { %v2587_v4 = vpop.f32.mrf.mxu1 }
 0xf9d   :  { %v2203_v6 = vpop.f32.mrf.mxu1 }
 0xf9e   :  { %2605 = vmatmul.mubr.msk.f32.vlgmr.msra.gmra.mxu1 %vm306_vm2, %v2203_v6 }
 0xf9f   :  { %v2601_v8 = vpop.f32.mrf.mxu1 }
0x105e   :  { %v2277_v9 = vpop.f32.mrf.mxu1 }
0x105f   :  { %v2281_v43 = vadd.f32 %v2277_v9, %v2034_v3 }
0x1060   :  { %v2606_v10 = vpop.f32.mrf.mxu1 }
0x1061   :  { %v2282_v11 = vadd.f32 %v3078_v2, %v2281_v43 }
0x1063   :  { %2283 = vst.msk [vmem:[#allocation11 + $0x8] sm:$0xff] %vm113_vm0, %v2282_v11 }
0x1064   :  { %2767 = shalt.err (!%p2764_p1)
}
0x1065   :  { %2295 = dma.vmem_to_hbm [thread:$0]  %s2290_s18, 256, %s3172_s8, [#allocation4], %s2786_s10, %s2786_s10, %s2787_s11  }
0x1066   :  { %2782 = dma.done.wait [#allocation4], 256  }
0x1067   :  { %2783 = vsyncadd [#allocation4], 4294967040 }
0x1068   :  { %2299 = vsyncpa [#allocation3], 1 }
0x1069   :  { %2300 = vsyncpa [#allocation6], 1 }
0x106a   :  { %2301 = vsyncpa [#allocation9], 1 }
0x106b   :  { %2302 = vsyncpa [#allocation4], 1 }

</bundles_post_ra>
